<compile_context>
chip_gen: v7x
topology: tpu7x:2x2x1
jax: 0.10.0
libtpu: 0.0.40
codegen_flags: <defaults>
</compile_context>

<pallas_src>
import functools

import jax
import jax.numpy as jnp
from jax import lax
from jax.experimental import pallas as pl
from jax.experimental.pallas import tpu as pltpu


def _round_up(x, m):
    return (x + m - 1) // m * m


def _head_kernel(x_ref, w_ref, b_ref, o_ref, *, hs_pad, scale, compute_dtype):
    # x_ref: (1, SL_pad, VS) in compute_dtype (bf16); one batch element per step.
    x = x_ref[0]                                            # (SL_pad, VS)

    # Fused Q/K/V projection: one lane-dense MXU matmul, f32 accumulation.
    qkv = jnp.dot(x, w_ref[...], preferred_element_type=jnp.float32)
    qkv = qkv + b_ref[...]                                  # (SL_pad, 3*hs_pad) f32

    # Column slices are lane-aligned (multiples of 128) -> no cross-lane work.
    q = (qkv[:, :hs_pad] * scale).astype(compute_dtype)     # scale folded into q
    k = qkv[:, hs_pad:2 * hs_pad].astype(compute_dtype)
    v = qkv[:, 2 * hs_pad:].astype(compute_dtype)

    # Scores: contract the head dim directly (no explicit transpose of k).
    s = lax.dot_general(q, k, dimension_numbers=(((1,), (1,)), ((), ())),
                        preferred_element_type=jnp.float32)  # (SL_pad, SL_pad)

    # Causal mask generated in-kernel (row >= col): two cheap VPU compares.
    sl = s.shape[0]
    row = lax.broadcasted_iota(jnp.int32, (sl, sl), 0)
    col = lax.broadcasted_iota(jnp.int32, (sl, sl), 1)
    s = jnp.where(row >= col, s, jnp.float32(-1e30))

    # Softmax in f32; reciprocal goes to the otherwise-idle EUP slot.
    m = jnp.max(s, axis=-1, keepdims=True)
    e = jnp.exp(s - m)
    p = e * pl.reciprocal(jnp.sum(e, axis=-1, keepdims=True), approx=True)

    # TODO(synk): dropout on attention weights skipped (inference identity).

    o = jnp.dot(p.astype(compute_dtype), v, preferred_element_type=jnp.float32)
    o_ref[0] = o.astype(o_ref.dtype)                        # single lane-dense store


def head_forward(x, wq, wk, wv, bq, bk, bv, *, compute_dtype=jnp.bfloat16):
    """x: (BS, SL, VS); wq/wk/wv: (VS, HS) (nn.Linear weight transposed);
    bq/bk/bv: (1, HS). Returns (BS, SL, HS) in x.dtype."""
    BS, SL, VS = x.shape
    HS = wq.shape[1]
    out_dtype = x.dtype

    # Pad to TPU-friendly shapes: lane-dense head dim, sublane-multiple seq.
    HS_pad = _round_up(HS, 128)
    SL_pad = _round_up(SL, 8)

    if SL_pad != SL:
        x = jnp.pad(x, ((0, 0), (0, SL_pad - SL), (0, 0)))

    def pad_w(w):
        return jnp.pad(w, ((0, 0), (0, HS_pad - HS)))

    def pad_b(b):
        return jnp.pad(b, ((0, 0), (0, HS_pad - HS)))

    # Fuse the three projections into one lane-dense (VS, 3*HS_pad) weight.
    w_fused = jnp.concatenate([pad_w(wq), pad_w(wk), pad_w(wv)], axis=1)
    b_fused = jnp.concatenate([pad_b(bq), pad_b(bk), pad_b(bv)], axis=1)

    # bf16 MXU operands (f32 accumulation in-kernel); bias stays f32.
    x_c = x.astype(compute_dtype)
    w_c = w_fused.astype(compute_dtype)
    b_c = b_fused.astype(jnp.float32)

    kernel = functools.partial(_head_kernel, hs_pad=HS_pad,
                               scale=float(HS) ** -0.5,
                               compute_dtype=compute_dtype)

    grid_spec = pltpu.PrefetchScalarGridSpec(
        num_scalar_prefetch=0,
        grid=(BS,),
        in_specs=[
            pl.BlockSpec((1, SL_pad, VS), lambda b: (b, 0, 0)),    # x, one batch row
            pl.BlockSpec((VS, 3 * HS_pad), lambda b: (0, 0)),      # fused Wqkv
            pl.BlockSpec((1, 3 * HS_pad), lambda b: (0, 0)),       # fused bias
        ],
        out_specs=pl.BlockSpec((1, SL_pad, HS_pad), lambda b: (b, 0, 0)),
    )

    out = pl.pallas_call(
        kernel,
        out_shape=jax.ShapeDtypeStruct((BS, SL_pad, HS_pad), out_dtype),
        grid_spec=grid_spec,
        compiler_params=pltpu.CompilerParams(
            dimension_semantics=("parallel",),
            vmem_limit_bytes=32 * 1024 * 1024),
    )(x_c, w_c, b_c)

    return out[:, :SL, :HS]


def head_reference(x, wq, wk, wv, bq, bk, bv, *, compute_dtype=jnp.bfloat16):
    """Pure-JAX reference mirroring the PyTorch forward with the same bf16
    MXU-operand casting as the kernel (f32 accumulation throughout)."""
    cd = compute_dtype
    xf = x.astype(cd)
    q = jnp.einsum('bsv,vh->bsh', xf, wq.astype(cd),
                   preferred_element_type=jnp.float32) + bq
    k = jnp.einsum('bsv,vh->bsh', xf, wk.astype(cd),
                   preferred_element_type=jnp.float32) + bk
    v = jnp.einsum('bsv,vh->bsh', xf, wv.astype(cd),
                   preferred_element_type=jnp.float32) + bv
    scale = wq.shape[1] ** -0.5
    s = jnp.einsum('bqh,bkh->bqk', (q * scale).astype(cd), k.astype(cd),
                   preferred_element_type=jnp.float32)
    SL = x.shape[1]
    causal = jnp.tril(jnp.ones((SL, SL), dtype=bool))
    s = jnp.where(causal, s, jnp.float32(-1e30))
    p = jax.nn.softmax(s, axis=-1)
    o = jnp.einsum('bqk,bkh->bqh', p.astype(cd), v.astype(cd),
                   preferred_element_type=jnp.float32)
    return o.astype(x.dtype)


if __name__ == "__main__":
    # Module hyper-params (synthetic, deterministic init)
    BS, SL, VS, HS = 2, 8, 32, 16      # batch, seq, embed_size, head_size
    BAIS = False                        # matches nn.Linear(..., bias=BAIS)

    key = jax.random.PRNGKey(0)
    kx, kq, kk, kv, kb = jax.random.split(key, 5)

    x = jax.random.normal(kx, (BS, SL, VS), dtype=jnp.float32)
    # nn.Linear weight is (out, in); pass it transposed as (VS, HS)
    wq = jax.random.normal(kq, (VS, HS), dtype=jnp.float32) * (VS ** -0.5)
    wk = jax.random.normal(kk, (VS, HS), dtype=jnp.float32) * (VS ** -0.5)
    wv = jax.random.normal(kv, (VS, HS), dtype=jnp.float32) * (VS ** -0.5)
    if BAIS:
        bq = jax.random.normal(kb, (1, HS), dtype=jnp.float32) * 0.1
        bk = bq * 0.5
        bv = bq * 0.25
    else:
        bq = jnp.zeros((1, HS), dtype=jnp.float32)
        bk = jnp.zeros((1, HS), dtype=jnp.float32)
        bv = jnp.zeros((1, HS), dtype=jnp.float32)

    out = head_forward(x, wq, wk, wv, bq, bk, bv)
    out = jax.block_until_ready(out)

    ref = head_reference(x, wq, wk, wv, bq, bk, bv)
    assert out.shape == (BS, SL, HS)
    # bf16 MXU operands + approx reciprocal -> slightly looser tolerance.
    assert jnp.allclose(out, ref, atol=2e-2, rtol=2e-2), "mismatch vs reference"

    print("KERNEL_OK")
</pallas_src>

<mosaic_0001>
module attributes {stable_mosaic.version = 11 : i64} {
  func.func @_head_kernel(%arg0: i32, %arg1: memref<1x8x32xbf16, #tpu.memory_space<vmem>>, %arg2: memref<32x384xbf16, #tpu.memory_space<vmem>>, %arg3: memref<1x384xf32, #tpu.memory_space<vmem>>, %arg4: memref<1x8x128xf32, #tpu.memory_space<vmem>>) attributes {dimension_semantics = [#tpu.dimension_semantics<parallel>], iteration_bounds = array<i64: 2>, scalar_prefetch = 0 : i64, scratch_operands = 0 : i64, tpu.core_type = #tpu.core_type<tc>, window_params = [{transform_indices = @transform_0, window_bounds = array<i64: 1, 8, 32>}, {pipeline_mode = #tpu.pipeline_mode<synchronous>, transform_indices = @transform_1, window_bounds = array<i64: 32, 384>}, {pipeline_mode = #tpu.pipeline_mode<synchronous>, transform_indices = @transform_2, window_bounds = array<i64: 1, 384>}, {transform_indices = @transform_3, window_bounds = array<i64: 1, 8, 128>}]} {
    %c0 = arith.constant 0 : index
    %c0_0 = arith.constant 0 : index
    %c0_1 = arith.constant 0 : index
    %0 = vector.load %arg1[%c0, %c0_0, %c0_1] : memref<1x8x32xbf16, #tpu.memory_space<vmem>>, vector<1x8x32xbf16>
    %1 = vector.shape_cast %0 : vector<1x8x32xbf16> to vector<8x32xbf16>
    %c0_2 = arith.constant 0 : index
    %c0_3 = arith.constant 0 : index
    %2 = vector.load %arg2[%c0_2, %c0_3] : memref<32x384xbf16, #tpu.memory_space<vmem>>, vector<32x384xbf16>
    %cst = arith.constant dense<0.000000e+00> : vector<8x384xf32>
    %3 = tpu.matmul %1, %2, %cst {dimension_numbers = #tpu.dot_dimension_numbers<[1], [0], [0], [1], [0, 0, 1, 1], [], []>} : vector<8x32xbf16>, vector<32x384xbf16>, vector<8x384xf32> -> vector<8x384xf32>
    %c0_4 = arith.constant 0 : index
    %c0_5 = arith.constant 0 : index
    %4 = vector.load %arg3[%c0_4, %c0_5] : memref<1x384xf32, #tpu.memory_space<vmem>>, vector<1x384xf32>
    %5 = vector.broadcast %4 : vector<1x384xf32> to vector<8x384xf32>
    %6 = arith.addf %3, %5 : vector<8x384xf32>
    %7 = vector.extract_strided_slice %6 {offsets = [0, 0], sizes = [8, 128], strides = [1, 1]} : vector<8x384xf32> to vector<8x128xf32>
    %cst_6 = arith.constant 2.500000e-01 : f32
    %8 = vector.broadcast %cst_6 : f32 to vector<8x128xf32>
    %9 = arith.mulf %7, %8 : vector<8x128xf32>
    %10 = arith.truncf %9 : vector<8x128xf32> to vector<8x128xbf16>
    %11 = vector.extract_strided_slice %6 {offsets = [0, 128], sizes = [8, 128], strides = [1, 1]} : vector<8x384xf32> to vector<8x128xf32>
    %12 = arith.truncf %11 : vector<8x128xf32> to vector<8x128xbf16>
    %13 = vector.extract_strided_slice %6 {offsets = [0, 256], sizes = [8, 128], strides = [1, 1]} : vector<8x384xf32> to vector<8x128xf32>
    %14 = arith.truncf %13 : vector<8x128xf32> to vector<8x128xbf16>
    %cst_7 = arith.constant dense<0.000000e+00> : vector<8x8xf32>
    %15 = tpu.matmul %10, %12, %cst_7 {dimension_numbers = #tpu.dot_dimension_numbers<[1], [1], [0], [0], [0, 0, 1, 0], [], []>} : vector<8x128xbf16>, vector<8x128xbf16>, vector<8x8xf32> -> vector<8x8xf32>
    %16 = tpu.iota {dimensions = array<i32: 0>} : vector<8x8xi32>
    %17 = tpu.iota {dimensions = array<i32: 1>} : vector<8x8xi32>
    %18 = arith.cmpi sge, %16, %17 : vector<8x8xi32>
    %cst_8 = arith.constant -1.000000e+30 : f32
    %19 = vector.broadcast %cst_8 : f32 to vector<8x8xf32>
    %20 = arith.select %18, %15, %19 : vector<8x8xi1>, vector<8x8xf32>
    %cst_9 = arith.constant dense<0xFF800000> : vector<8xf32>
    %21 = vector.multi_reduction <maximumf>, %20, %cst_9 [1] : vector<8x8xf32> to vector<8xf32>
    %22 = vector.shape_cast %21 : vector<8xf32> to vector<8x1xf32>
    %23 = vector.broadcast %22 : vector<8x1xf32> to vector<8x8xf32>
    %24 = arith.subf %20, %23 : vector<8x8xf32>
    %25 = math.exp %24 : vector<8x8xf32>
    %cst_10 = arith.constant dense<0.000000e+00> : vector<8xf32>
    %26 = vector.multi_reduction <add>, %25, %cst_10 [1] : vector<8x8xf32> to vector<8xf32>
    %27 = vector.shape_cast %26 : vector<8xf32> to vector<8x1xf32>
    %28 = tpu.reciprocal %27 {approx = true} : vector<8x1xf32> -> vector<8x1xf32>
    %29 = vector.broadcast %28 : vector<8x1xf32> to vector<8x8xf32>
    %30 = arith.mulf %25, %29 : vector<8x8xf32>
    %31 = arith.truncf %30 : vector<8x8xf32> to vector<8x8xbf16>
    %cst_11 = arith.constant dense<0.000000e+00> : vector<8x128xf32>
    %32 = tpu.matmul %31, %14, %cst_11 {dimension_numbers = #tpu.dot_dimension_numbers<[1], [0], [0], [1], [0, 0, 1, 1], [], []>} : vector<8x8xbf16>, vector<8x128xbf16>, vector<8x128xf32> -> vector<8x128xf32>
    %c0_12 = arith.constant 0 : index
    %c0_13 = arith.constant 0 : index
    %c0_14 = arith.constant 0 : index
    %33 = vector.load %arg4[%c0_12, %c0_13, %c0_14] : memref<1x8x128xf32, #tpu.memory_space<vmem>>, vector<1x8x128xf32>
    %34 = vector.shape_cast %33 : vector<1x8x128xf32> to vector<8x128xf32>
    %35 = vector.shape_cast %32 : vector<8x128xf32> to vector<1x8x128xf32>
    tpu.vector_store %arg4[%c0_12, %c0_13, %c0_14], %35 {strides = array<i32>} : memref<1x8x128xf32, #tpu.memory_space<vmem>>, vector<1x8x128xf32>,
    return
  }
  func.func @transform_0(%arg0: i32) -> (i32, i32, i32) {
    %c0_i32 = arith.constant 0 : i32
    %c0_i32_0 = arith.constant 0 : i32
    %c0_i32_1 = arith.constant 0 : i32
    return %arg0, %c0_i32, %c0_i32_0 : i32, i32, i32
  }
  func.func @transform_1(%arg0: i32) -> (i32, i32) {
    %c0_i32 = arith.constant 0 : i32
    %c0_i32_0 = arith.constant 0 : i32
    %c0_i32_1 = arith.constant 0 : i32
    return %c0_i32, %c0_i32_0 : i32, i32
  }
  func.func @transform_2(%arg0: i32) -> (i32, i32) {
    %c0_i32 = arith.constant 0 : i32
    %c0_i32_0 = arith.constant 0 : i32
    %c0_i32_1 = arith.constant 0 : i32
    return %c0_i32, %c0_i32_0 : i32, i32
  }
  func.func @transform_3(%arg0: i32) -> (i32, i32, i32) {
    %c0_i32 = arith.constant 0 : i32
    %c0_i32_0 = arith.constant 0 : i32
    %c0_i32_1 = arith.constant 0 : i32
    return %arg0, %c0_i32, %c0_i32_0 : i32, i32, i32
  }
}

</mosaic_0001>

<bundles_post_ra>
// kernel: tpu_custom_call.1
= control target key start
LH: loop header
LB: loop body
LE: loop exit
PB: predicated region body
PF: predicated region fallthrough
CT: control target
= control target key end

     0   :  { %8 = vsyncpa [#allocation3], 0  ;;  %s1040_s0 = inlined_call_operand.hbm [shape: bf16[2,8,32], index: 0, kind: input, shape index: {}]   ;;  %s1041_s1 = inlined_call_operand.hbm [shape: bf16[32,384], index: 1, kind: input, shape index: {}]   ;;  %s1042_s2 = inlined_call_operand.vmem [shape: f32[1,384], index: 2, kind: input, shape index: {}]   ;;  %s1043_s3 = inlined_call_operand.hbm [shape: f32[2,8,128], index: 3, kind: output, shape index: {}]  }
   0x1   :  { %10 = vsyncpa [#allocation3 + $0x1], 0 }
   0x2   :  { %11 = vsyncpa [#allocation6], 0 }
   0x3   :  { %12 = vsyncpa [#allocation4], 0 }
   0x4   :  { %14 = vsyncpa [#allocation4 + $0x1], 0  ;;  %s832_s12 = smov 0   ;;  %s834_s13 = smov 0  }
   0x5   :  { %s836_s14 = smov 0   ;;  %s838_s15 = smov 0  }
   0x6 LB: > { %s853_s16 = sadd.s32 4294967295, %s802_s15   ;;  %s550_s17 = sadd.s32 4294967294, %s802_s15   ;;  %s802_s15 = sphi %s838_s15, %s1063_s15   ;;  %s798_s14 = sphi %s836_s14, %s1062_s14   ;;  %s794_s13 = sphi %s834_s13, %s1061_s13   ;;  %s790_s12 = sphi %s832_s12, %s1060_s12  }
   0x7   : > { %p40_p0 = scmp.ne.s32.totalorder %s794_s13, %s790_s12  ;;  %p1044_p1 = scmp.eq.s32.totalorder %s853_s16, 0 }
   0x8   : > { %p112_p3 = scmp.eq.s32.totalorder %s550_s17, 1  ;;  %p551_p5 = scmp.ge.s32.totalorder %s802_s15, 1 }
   0x9   : > { %p862_p4 = por %p1044_p1, %p40_p0  ;;  %p119_p7 = scmp.lt.s32.totalorder %s802_s15, 3 }
   0xa   : > { %p867_p6 = por %p112_p3, %p40_p0  ;;  %s804_s21 = smov [#allocation5]  }
   0xb   : > { %s1047_s18 = scalar_select %p862_p4, 1, 0 }
   0xc   : > { %s1048_s19 = scalar_select %p867_p6, 1, 0 }
   0xd   : > { %p872_p8 = pnand %p551_p5, %p119_p7  ;;  %s131_s22 = sshll.u32 %s804_s21, 4  ;;  %s876_s22 = int_to_ptr.vmem [resolvable:$true] %s131_s22 }
   0xe   : > { %s888_s24 = sadd.s32 1, %s802_s15   ;;  %s27_s25 = sadd.s32 1, %s798_s14 }
   0xf   : > { %s1049_s20 = scalar_select %p872_p8, 1, 0 }
  0x10   : > { %p608_p9 = pneg %p872_p8  ;;  %s24_s26 = ssub.s32 %s802_s15, %s888_s24 }
  0x11   : > { %s674_s29 = scalar_lea.hbm %s1041_s1, 768 }
  0x12   : > { %p883_p11 = pnand %p608_p9, %p1044_p1  ;;  %p675_p12 = scmp.ne.s32.totalorder %s1041_s1, %s674_s29 }
  0x13   : > { %p681_p5 = scmp.lt.u32.totalorder %s674_s29, %s1041_s1 }
  0x14   : > { %p676_p13 = pneg %p883_p11 }
  0x16   : > { %p677_p0 = pnand %p676_p13, %p675_p12 }
  0x18   : > { %p678_p3 = pneg %p677_p0 }
  0x1a   : > { %p683_p7 = pnand %p681_p5, %p678_p3 }
  0x1c   : > { %686 = shalt.err (!%p683_p7)
}
  0x1d   : > { %s687_s7 = scalar_lea.vmem %s876_s22, 768  ;;  %p695_p2 = scmp.lt.s32.totalorder %s876_s22, %s876_s22 }
  0x1e   : > { %p688_p9 = scmp.ne.s32.totalorder %s876_s22, %s687_s7  ;;  %p696_p6 = scmp.lt.s32.totalorder %s687_s7, %s687_s7 }
  0x20   : > { %p690_p10 = pnand %p688_p9, %p676_p13  ;;  %p697_p4 = por %p696_p6, %p695_p2 }
  0x22   : > { %p691_p1 = pneg %p690_p10 }
  0x24   : > { %p698_p8 = pnand %p697_p4, %p691_p1 }
  0x26   : > { %701 = shalt.err (!%p698_p8)
}
  0x27   : > { %s805_s8 = smov 192   ;;  %s806_s9 = smov 12  }
  0x28   : > { %611 = dma.hbm_to_vmem [thread:$0]  (!%p883_p11), %s1041_s1, 768, %s876_s22, [#allocation6], %s805_s8, %s805_s8, %s806_s9  }
  0x29   : > { %p25_p2 = scmp.eq.s32.totalorder %s24_s26, 0  ;;  %p34_p1 = scmp.ne.s32.totalorder %s798_s14, %s794_s13 }
  0x2a   : > { %p35_p4 = scmp.eq.s32.totalorder %s802_s15, 0  ;;  %p621_p6 = scmp.lt.s32.totalorder %s802_s15, 2 }
  0x2b   : > { %s919_s17 = scalar_select %p25_p2, %s798_s14, %s27_s25  }
  0x2c   : > { %p36_p8 = por %p35_p4, %p34_p1  ;;  %p1051_p10 = scmp.eq.s32.totalorder %s853_s16, 1 }
  0x2d   : > { %s148_s27 = sand.u32 1, %s798_s14   ;;  %s555_s28 = sshll.u32 %s802_s15, 6 }
  0x2e   : > { %p923_p12 = por %p1051_p10, %p34_p1  ;;  %s554_s29 = sshll.u32 %s148_s27, 2 }
  0x2f   : > { %s932_s4 = scalar_lea.hbm %s1040_s0, %s555_s28  ;;  %s152_s22 = scalar_lea.vmem [#allocation2], %s554_s29 }
  0x30   : > { %s159_s25 = sshll.u32 %s152_s22, 4  ;;  %p934_p11 = pnand %p621_p6, %p36_p8  ;;  %s938_s25 = int_to_ptr.vmem [resolvable:$true] %s159_s25 }
  0x31   : > { %s149_s5 = scalar_lea.sflag [#allocation3], %s148_s27  ;;  %s702_s6 = scalar_lea.hbm %s932_s4, 64 }
  0x32   : > { %p703_p13 = scmp.ne.s32.totalorder %s932_s4, %s702_s6  ;;  %p704_p0 = pneg %p934_p11 }
  0x33   : > { %s707_s9 = scalar_lea.hbm %s1040_s0, 128  ;;  %p708_p7 = scmp.lt.u32.totalorder %s932_s4, %s1040_s0 }
  0x34   : > { %p705_p3 = pnand %p704_p0, %p703_p13  ;;  %p709_p9 = scmp.lt.u32.totalorder %s707_s9, %s702_s6 }
  0x35   : > { %p711_p1 = scmp.lt.u32.totalorder %s702_s6, %s932_s4 }
  0x36   : > { %p706_p5 = pneg %p705_p3  ;;  %p710_p2 = por %p709_p9, %p708_p7 }
  0x38   : > { %p712_p4 = por %p711_p1, %p710_p2 }
  0x3a   : > { %p713_p6 = pnand %p712_p4, %p706_p5 }
  0x3c   : > { %716 = shalt.err (!%p713_p6)
}
  0x3d   : > { %s717_s27 = scalar_lea.vmem %s938_s25, 64  ;;  %s807_s28 = smov [#allocation2]  }
  0x3e   : > { %p718_p8 = scmp.ne.s32.totalorder %s938_s25, %s717_s27  ;;  %s722_s29 = sshll.u32 %s807_s28, 4  ;;  %s723_s29 = int_to_ptr.vmem [resolvable:$false] %s722_s29 }
  0x3f   : > { %s724_s23 = scalar_lea.vmem %s723_s29, 128  ;;  %p725_p3 = scmp.lt.s32.totalorder %s938_s25, %s723_s29 }
  0x40   : > { %p720_p10 = pnand %p718_p8, %p704_p0  ;;  %p726_p7 = scmp.lt.s32.totalorder %s724_s23, %s717_s27 }
  0x42   : > { %p721_p13 = pneg %p720_p10  ;;  %p727_p9 = por %p726_p7, %p725_p3 }
  0x44   : > { %p728_p2 = pnand %p727_p9, %p721_p13 }
  0x46   : > { %731 = shalt.err (!%p728_p2)
}
  0x47   : > { %615 = dma.hbm_to_vmem [thread:$0]  (!%p934_p11), %s932_s4, 64, %s938_s25, %s149_s5  }
  0x48   : > { %p1054_p5 = scmp.ne.s32.totalorder %s1049_s20, 0 }
  0x49   : > { %s968_s30 = sand.u32 (!%p1054_p5), 1, %s794_s13   ;;  %p1055_p0 = scmp.ne.s32.totalorder (!%p1054_p5), %s1047_s18, 0 }
  0x4a   : > { %168 = sbr.rel (%p1054_p5) target bundleno = 1074 (0x432), region = 32  ;;  %s557_s22 = sshll.u32 (!%p1054_p5), %s968_s30, 2 }
  0x4b   : > { %s171_s6 = scalar_lea.sflag (!%p1054_p5), [#allocation3], %s968_s30  ;;  %s174_s7 = scalar_lea.vmem (!%p1054_p5), [#allocation2], %s557_s22 }
  0x51   : > { %777 = dma.done.wait (%p1055_p0), %s171_s6, 64  }
  0x52   : > { %779 = vsyncadd (%p1055_p0), %s171_s6, 4294967232  ;;  %p1056_p1 = scmp.eq.s32.totalorder %s853_s16, 0 }
  0x54   : > { %781 = dma.done.wait (%p1056_p1), [#allocation6], 768   ;;  %p1057_p11 = pmov %p1056_p1 }
  0x55   : > { %v808_v0 = vmov 0   ;;  %v662_v1 = vld [vmem:[#allocation5 + $0x4] ss:$12 sps:$4 sm:$0xff]   ;;  %v664_v2 = vld [vmem:[#allocation5] ss:$12 sps:$4 sm:$0xff]   ;;  %vm260_vm0 = vcmask 261120   ;;  %v213_v7 = vlaneseq }
  0x56   : > { %783 = vsyncadd (%p1057_p11), [#allocation6], 4294966528  ;;  %296 = vmatprep.mubr.bf16.mxu0 %v808_v0  ;;  %264 = vmatprep.subr.bf16.mxu0 %v662_v1  ;;  %v665_v3 = vld [vmem:[#allocation5 + $0x1c] ss:$12 sps:$4 sm:$0xff]   ;;  %v667_v4 = vld [vmem:[#allocation5 + $0x18] ss:$12 sps:$4 sm:$0xff]  }
  0x57   : > { %265 = vmatpush1.bf16.msra.mxu0 %v664_v2  ;;  %v202_v5 = vld [vmem:[%s174_s7] sm:$0xf]  ;;  %v809_v6 = vmov 0.0   ;;  %vm810_vm1 = vmmov 0   ;;  %v214_v8 = vshrl.u32 %v213_v7, 7  ;;  %v392_v25 = vand.u32 127, %v213_v7 }
  0x58   : > { %266 = vmatprep.subr.bf16.mxu0 %v665_v3  ;;  %580 = vmatprep.subr.bf16.mxu1 %v809_v6  ;;  %v211_v10 = vld [vmem:[%s1042_s2] sm:$0x7]  ;;  %v668_v23 = vld [vmem:[#allocation5 + $0x8] ss:$12 sps:$4 sm:$0xff]   ;;  %v669_v24 = vld [vmem:[#allocation5 + $0x20] ss:$12 sps:$4 sm:$0xff]  }
  0x59   : > { %584 = vmatprep.mubr.msk.bf16.mxu1 %vm810_vm1, %v809_v6  ;;  %v219_v9 = vsub.s32 1, %v214_v8  ;;  %v215_v11 = vsub.s32 0, %v214_v8  ;;  %581 = vmatpush3.bf16.msra.mxu1 %v668_v23  ;;  %vm393_vm2 = vcmp.ge.s32.totalorder %v214_v8, %v392_v25  ;;  %vm395_vm3 = vcmask 64512   ;;  %s559_s4 = sshll.u32 %s968_s30, 3  ;;  %s570_s5 = sshll.u32 %s853_s16, 7 }
  0x5a   : > { %582 = vmatprep.subr.bf16.mxu1 %v809_v6  ;;  %v223_v32 = vsub.s32 2, %v214_v8  ;;  %vm411_vm4 = vcmask 1043456   ;;  %s200_s25 = scalar_lea.vmem [#allocation7], %s559_s4  ;;  %s998_s10 = scalar_lea.hbm %s1043_s3, %s570_s5 }
  0x5b   : > { %267 = vmatpush1.bf16.msra.mxu0 %v667_v4  ;;  %v220_v12 = vrot.slane %v211_v10, %v219_v9  ;;  %v216_v13 = vrot.slane %v211_v10, %v215_v11  ;;  %s470_s26 = sshll.u32 %s200_s25, 4  ;;  %s457_s11 = scalar_lea.sflag [#allocation4], %s968_s30  ;;  %s993_s26 = int_to_ptr.vmem [resolvable:$true] %s470_s26 }
  0x5c   : > { %588 = vmatprep.subr.bf16.mxu0 %v809_v6  ;;  %v224_v33 = vrot.slane %v211_v10, %v223_v32  ;;  %s732_s27 = scalar_lea.vmem %s993_s26, 128  ;;  %s811_s16 = smov [#allocation7]  }
  0x5d   : > { %583 = vmatpush3.bf16.msra.mxu1 %v669_v24  ;;  %p733_p4 = scmp.ne.s32.totalorder %s993_s26, %s732_s27  ;;  %s736_s28 = sshll.u32 %s811_s16, 4  ;;  %s737_s28 = int_to_ptr.vmem [resolvable:$false] %s736_s28 }
  0x5e   : > { %566 = vmatmul.mubr.msk.bf16.vlgmr.msra.gmra.mrb[0].mxu0 %vm260_vm0, %v202_v5  ;;  %594 = vmatprep.subr.bf16.mxu1 %v809_v6  ;;  %s738_s29 = scalar_lea.vmem %s737_s28, 256  ;;  %p739_p10 = scmp.lt.s32.totalorder %s993_s26, %s737_s28 }
  0x5f   : > { %590 = vmatprep.mubr.msk.bf16.mxu0 %vm810_vm1, %v809_v6  ;;  %p734_p6 = pnand %p733_p4, %p923_p12  ;;  %p740_p13 = scmp.lt.s32.totalorder %s738_s29, %s732_s27 }
  0x60   : > { %585 = vmatmul.mubr.msk.bf16.vlgmr.msra.gmra.mrb[0].mxu1 %vm260_vm0, %v202_v5 }
  0x61   : > { %596 = vmatprep.mubr.msk.bf16.mxu1 %vm810_vm1, %v809_v6  ;;  %p735_p8 = pneg %p734_p6  ;;  %p741_p3 = por %p740_p13, %p739_p10 }
  0x63   : > { %p742_p7 = pnand %p741_p3, %p735_p8 }
 0x131   : > { %v298_v14 = vpop.f32.mrb[0].mxu0 }
 0x132   : > { %v300_v15 = vpop.f32.mrb[1].mxu0  ;;  %v299_v18 = vadd.f32 %v298_v14, %v216_v13 }
 0x133   : > { %v301_v16 = vadd.f32 %v300_v15, %v220_v12  ;;  %v302_v17 = vpop.f32.mrb[2].mxu0  ;;  %v339_v34 = vpop.f32.mrb[0].mxu1 }
 0x134   : > { %v303_v19 = vpop.f32.mrb[3].mxu0  ;;  %v345_v21 = vmul.f32 0.25, %v299_v18  ;;  %v340_v35 = vadd.f32 %v339_v34, %v224_v33  ;;  %v586_v36 = vpop.f32.mrb[1].mxu1 }
 0x135   : > { %v347_v20 = vpack.c.bf16 %v301_v16, %v301_v16  ;;  %v342_v37 = vpop.f32.mrb[2].mxu1 }
 0x136   : > { %v346_v22 = vpack.c.bf16 %v345_v21, %v345_v21  ;;  %v348_v38 = vpack.c.bf16 %v340_v35, %v340_v35  ;;  %v587_v39 = vpop.f32.mrb[3].mxu1 }
 0x137   : > { %589 = vmatpush3.bf16.xpose.msra.mxu0 %v347_v20 }
 0x138   : > { %v413_v40 = vsel %vm411_vm4, %v348_v38, 0 }
 0x139   : > { %595 = vmatpush3.bf16.msra.mxu1 %v413_v40 }
 0x13e   : > { %591 = vmatmul.mubr.bf16.vlgmr.msra.gmra.mrb[4].mxu0 %v346_v22 }
 0x211   : > { %v383_v26 = vpop.f32.mrb[4].mxu0 }
 0x212   : > { %v394_v27 = vsel %vm393_vm2, %v383_v26, -1e+30  ;;  %v592_v28 = vpop.f32.mrb[5].mxu0 }
 0x213   : > { %v386_v29 = vpop.f32.mrb[6].mxu0  ;;  %v396_v30 = vsel %vm395_vm3, %v394_v27, -inf }
 0x214   : > { %397 = vmax.xlane.f32.xlu0 %v396_v30  ;;  %v593_v31 = vpop.f32.mrb[7].mxu0 }
 0x2a1   : > { %v398_v41 = vpop.xlane.xlu0 %397 }
 0x2a2   : > { %v399_v42 = vsub.f32 %v394_v27, %v398_v41 }
 0x2a4   : > { %v400_v43 = vmul.f32 1.442695, %v399_v42 }
 0x2a6   : > { %670 = vpow2.f32 %v400_v43 }
 0x2b0   : > { %v671_v44 = vpop.eup %670 }
 0x2b1   : > { %v402_v45 = vsel %vm395_vm3, %v671_v44, 0.0 }
 0x2b2   : > { %403 = vadd.xlane.f32.xlu0 %v402_v45 }
 0x33f   : > { %v404_v46 = vpop.xlane.xlu0 %403 }
 0x340   : > { %672 = vrcp.f32 %v404_v46 }
 0x34a   : > { %v673_v47 = vpop.eup %672 }
 0x34b   : > { %v406_v48 = vmul.f32 %v673_v47, %v671_v44 }
 0x34d   : > { %v407_v49 = vpack.c.bf16 %v406_v48, %v406_v48 }
 0x34f   : > { %597 = vmatmul.mubr.msk.bf16.vlgmr.msra.gmra.mrb[4].mxu1 %vm395_vm3, %v407_v49 }
 0x422   : > { %v449_v50 = vpop.f32.mrb[4].mxu1 }
 0x423   : > { %455 = vst [vmem:[%s200_s25] sm:$0xff] %v449_v50  ;;  %v598_v51 = vpop.f32.mrb[5].mxu1 }
 0x424   : > { %v452_v52 = vpop.f32.mrb[6].mxu1 }
 0x425   : > { %745 = shalt.err (!%p742_p7)
}
 0x426   : > { %s746_s23 = scalar_lea.hbm %s998_s10, 128  ;;  %s750_s6 = scalar_lea.hbm %s1043_s3, 256 }
 0x427   : > { %p747_p9 = scmp.ne.s32.totalorder %s998_s10, %s746_s23  ;;  %p751_p0 = scmp.lt.u32.totalorder %s998_s10, %s1043_s3 }
 0x428   : > { %p752_p1 = scmp.lt.u32.totalorder %s750_s6, %s746_s23  ;;  %p754_p4 = scmp.lt.u32.totalorder %s746_s23, %s998_s10 }
 0x429   : > { %p748_p2 = pnand %p747_p9, %p923_p12 }
 0x42a   : > { %p753_p11 = por %p752_p1, %p751_p0 }
 0x42b   : > { %p749_p5 = pneg %p748_p2 }
 0x42c   : > { %p755_p6 = por %p754_p4, %p753_p11 }
 0x42e   : > { %p756_p8 = pnand %p755_p6, %p749_p5 }
 0x430   : > { %759 = shalt.err (!%p756_p8)
}
 0x431   : > { %606 = dma.vmem_to_hbm [thread:$0]  (%p923_p12), %s993_s26, 128, %s998_s10, %s457_s11   ;;  %v599_v53 = vpop.f32.mrb[7].mxu1 }
 0x432 PF: > { %s482_s20 = sand.u32 1, %s790_s12   ;;  %p1058_p10 = scmp.ne.s32.totalorder %s1048_s19, 0 }
 0x433   : > { %p1059_p13 = scmp.ge.s32.totalorder %s802_s15, 2  ;;  %s483_s4 = scalar_lea.sflag [#allocation4], %s482_s20 }
 0x435   : > { %p617_p3 = pnand %p1059_p13, %p1058_p10 }
 0x437   : > { %785 = dma.done.wait (!%p617_p3), %s483_s4, 128  }
 0x438   : > { %787 = vsyncadd (!%p617_p3), %s483_s4, 4294967168  ;;  %p17_p7 = scmp.ge.s32.totalorder %s888_s24, 4   ;;  %s1060_s12 = smov %s794_s13 }
 0x439   : > { %s1061_s13 = smov %s798_s14  ;;  %s1062_s14 = smov %s919_s17 }
 0x43a   : > { %s1063_s15 = smov %s888_s24  ;;  %19 = sbr.rel (!%p17_p7) target bundleno = 6 (0x6), region = 81 }
 0x441   :  { %488 = vsyncpa [#allocation3], 1 }
 0x442   :  { %490 = vsyncpa [#allocation3 + $0x1], 1 }
 0x443   :  { %491 = vsyncpa [#allocation6], 1 }
 0x444   :  { %492 = vsyncpa [#allocation4], 1 }
 0x445   :  { %494 = vsyncpa [#allocation4 + $0x1], 1 }

</bundles_post_ra>
